<compile_context>
chip_gen: v7x
topology: tpu7x:2x2x1
jax: 0.10.0
libtpu: 0.0.40
codegen_flags: <defaults>
</compile_context>

<pallas_src>
import functools

import jax
import jax.numpy as jnp
from jax.experimental import pallas as pl
from jax.experimental.pallas import tpu as pltpu


def _round_up(x, m):
    return ((x + m - 1) // m) * m


def _device_vmem_bytes():
    """Physical VMEM of the attached TPU; conservative 64 MiB (v7x) fallback."""
    try:
        cap = int(pltpu.get_tpu_info().vmem_capacity_bytes)
        if cap > 0:
            return cap
    except Exception:
        pass
    return 64 * 2**20


# ----------------------------------------------------------------------------- kernel
def _moe_expert_kernel(sched_ref, cnt_ref, x_ref, cw_ref, wgu_ref, wd_ref,
                       o_ref, acc_ref, *, inter_size, n_expert_slots):
    """Grid = (token_tile, expert_slot). acc_ref (f32 VMEM scratch) accumulates the
    weighted expert outputs across the expert axis; o_ref is written once."""
    t = pl.program_id(0)
    s = pl.program_id(1)

    @pl.when(s == 0)
    def _init():
        acc_ref[...] = jnp.zeros_like(acc_ref)

    # Only compute for experts actually used by this token tile; padded slots repeat
    # the previous expert id in the schedule (=> no new weight DMA either).
    @pl.when(s < cnt_ref[t])
    def _compute():
        eid = sched_ref[t * n_expert_slots + s]            # real expert id (SMEM scalar)
        xb = x_ref[...]                                    # (TT, H) bf16 (cast in wrapper)
        # fused gate||up projection: one MXU stream, split at lane-aligned I boundary
        gu = jnp.dot(xb, wgu_ref[...], preferred_element_type=jnp.float32)   # (TT, 2I)
        g = gu[:, :inter_size]
        u = gu[:, inter_size:]
        h = (g * jax.nn.sigmoid(g)) * u                    # SwiGLU, f32 epilogue
        y = jnp.dot(h.astype(jnp.bfloat16), wd_ref[...],
                    preferred_element_type=jnp.float32)    # (TT, H) f32
        # combine weight for expert `eid`: masked reduce over lane-dense (TT, E) block
        lane = jax.lax.broadcasted_iota(jnp.int32, cw_ref.shape, 1)
        cw = jnp.sum(jnp.where(lane == eid, cw_ref[...], 0.0),
                     axis=-1, keepdims=True)               # (TT, 1)
        acc_ref[...] += cw * y

    @pl.when(s == pl.num_programs(1) - 1)
    def _finalize():
        o_ref[...] = acc_ref[...].astype(o_ref.dtype)


def moe_experts_pallas(x_pad, combine_w, sched_flat, cnt, wgu, wd, *,
                       token_tile, out_dtype, max_weight_buffers=3):
    """x_pad: (T_pad, H) bf16; combine_w: (T_pad, E_tot) f32;
    sched_flat: (num_tiles*E_tot,) int32, cnt: (num_tiles,) int32 (scalar prefetch);
    wgu: (E_tot, H, 2I) bf16; wd: (E_tot, I, H) bf16."""
    T_pad, H = x_pad.shape
    E_tot, _, I2 = wgu.shape
    I = I2 // 2
    TT = token_tile
    num_tiles = T_pad // TT

    # ---- VMEM budget, clamped to the *actual* device VMEM (96 MiB was illegal on v7x)
    vmem_cap = _device_vmem_bytes()
    budget = int(vmem_cap * 0.8)                       # headroom for Mosaic scratch
    w_bytes_per_buf = (H * I2 + I * H) * wgu.dtype.itemsize

    def est_bytes(nbuf):
        return (nbuf * w_bytes_per_buf                 # wgu/wd tiles, nbuf-deep
                + 2 * TT * H * x_pad.dtype.itemsize    # x tiles (bf16, double-buffered)
                + 2 * TT * E_tot * 4                   # combine-weight tiles
                + 2 * TT * H * jnp.dtype(out_dtype).itemsize
                + TT * H * 4                           # f32 accumulator scratch
                + 8 * TT * I * 4)                      # in-kernel f32 temporaries

    nbuf = max_weight_buffers if (max_weight_buffers > 2
                                  and est_bytes(max_weight_buffers) <= budget) else 2
    vmem_limit = int(min(max(2 * est_bytes(nbuf), 32 * 2**20), budget))

    # ---- specs (scalar-prefetch refs are positional trailing args of every index_map)
    def x_map(t, s, sched, cnt):
        return (t, 0)

    def cw_map(t, s, sched, cnt):
        return (t, 0)

    def w_map(t, s, sched, cnt):
        return (sched[t * E_tot + s], 0, 0)

    def o_map(t, s, sched, cnt):
        return (t, 0)

    def weight_spec(shape):
        if nbuf > 2:
            try:
                return pl.BlockSpec(shape, w_map, pipeline_mode=pl.Buffered(nbuf))
            except TypeError:
                pass                                   # older Pallas: fall back to 2-deep
        return pl.BlockSpec(shape, w_map)

    grid_spec = pltpu.PrefetchScalarGridSpec(
        num_scalar_prefetch=2,
        grid=(num_tiles, E_tot),
        in_specs=[
            pl.BlockSpec((TT, H), x_map),              # x tile (bf16)
            pl.BlockSpec((TT, E_tot), cw_map),         # combine weights
            weight_spec((None, H, I2)),                # fused gate||up weights
            weight_spec((None, I, H)),                 # down weights
        ],
        out_specs=pl.BlockSpec((TT, H), o_map),
        scratch_shapes=[pltpu.VMEM((TT, H), jnp.float32)],
    )
    kernel = functools.partial(_moe_expert_kernel,
                               inter_size=I, n_expert_slots=E_tot)
    return pl.pallas_call(
        kernel,
        out_shape=jax.ShapeDtypeStruct((T_pad, H), out_dtype),
        grid_spec=grid_spec,
        compiler_params=pltpu.CompilerParams(
            dimension_semantics=("parallel", "arbitrary"),
            vmem_limit_bytes=vmem_limit),
    )(sched_flat, cnt, x_pad, combine_w, wgu, wd)


# ----------------------------------------------------------------------------- glue
def moe_gate(x_flat, gate_w, top_k, norm_topk_prob=True):
    """MoEGate (eval mode, aux_loss = 0). Tiny -> plain JAX, f32."""
    logits = x_flat.astype(jnp.float32) @ gate_w.astype(jnp.float32).T
    scores = jax.nn.softmax(logits, axis=-1)
    topk_w, topk_idx = jax.lax.top_k(scores, top_k)
    if top_k > 1 and norm_topk_prob:
        topk_w = topk_w / (jnp.sum(topk_w, axis=-1, keepdims=True) + 1e-20)
    return topk_idx, topk_w


def prepare_moe_params(params, *, weight_dtype=jnp.bfloat16):
    """Call ONCE outside the jitted forward: concatenates routed + shared experts,
    fuses gate||up into one (E_tot, H, 2I) tensor, casts matmul weights to bf16."""
    wg = jnp.concatenate([params["routed_wg"], params["shared_wg"]], axis=0)
    wu = jnp.concatenate([params["routed_wu"], params["shared_wu"]], axis=0)
    wd = jnp.concatenate([params["routed_wd"], params["shared_wd"]], axis=0)
    return {
        "gate_w": params["gate_w"].astype(jnp.float32),
        "wgu": jnp.concatenate([wg, wu], axis=-1).astype(weight_dtype),  # (E_tot, H, 2I)
        "wd": wd.astype(weight_dtype),                                    # (E_tot, I, H)
    }


def moe_feedforward(x, prepared, *, top_k, norm_topk_prob=True,
                    token_tile=512, max_weight_buffers=3):
    """Full MOEFeedForward forward (inference path). Output dtype == input dtype.
    token_tile guidance: ~512 on v6e/v7x prefill (MXU is 256-wide, HBM roofline
    needs high arithmetic intensity); cap at ~256 on v5e (128-wide MXU)."""
    bsz, seq_len, H = x.shape
    T = bsz * seq_len
    out_dtype = x.dtype
    x_flat = x.reshape(T, H)

    E = prepared["gate_w"].shape[0]            # routed experts
    E_tot = prepared["wgu"].shape[0]           # routed + shared
    n_shared = E_tot - E

    # gating (tiny, plain JAX, f32)
    topk_idx, topk_w = moe_gate(x_flat, prepared["gate_w"], top_k, norm_topk_prob)

    # token tiling / padding; activations cast to bf16 ONCE here
    TT = _round_up(min(token_tile, _round_up(T, 8)), 8)
    T_pad = _round_up(T, TT)
    num_tiles = T_pad // TT
    x_pad = jnp.zeros((T_pad, H), jnp.bfloat16).at[:T].set(x_flat.astype(jnp.bfloat16))

    # dense combine weights: top-k weights scattered, 0 elsewhere; shared experts = 1
    routed_cw = jnp.zeros((T_pad, E), jnp.float32).at[
        jnp.arange(T)[:, None], topk_idx].set(topk_w.astype(jnp.float32))
    shared_cw = jnp.ones((T_pad, n_shared), jnp.float32)
    combine_w = jnp.concatenate([routed_cw, shared_cw], axis=-1)        # (T_pad, E_tot)

    # per-tile expert schedule (scalar prefetch): only experts used by the tile,
    # serpentine-ordered (reversed on odd tiles) so the always-used shared expert that
    # ends tile t is also slot 0 of tile t+1 -> its weight DMA is skipped; padded slots
    # repeat the last valid id (no new DMA) and are compute-skipped in-kernel via cnt.
    used = (combine_w.reshape(num_tiles, TT, E_tot) > 0.0).any(axis=1)  # (nt, E_tot)
    cnt = used.sum(axis=-1).astype(jnp.int32)                           # (nt,)
    sched_fwd = jnp.argsort((~used).astype(jnp.int32), axis=-1).astype(jnp.int32)
    slot = jnp.arange(E_tot, dtype=jnp.int32)[None, :]
    rev_idx = jnp.clip(cnt[:, None] - 1 - slot, 0, E_tot - 1)
    sched_rev = jnp.take_along_axis(sched_fwd, rev_idx, axis=1)
    odd = (jnp.arange(num_tiles, dtype=jnp.int32)[:, None] & 1) == 1
    sched_valid = jnp.where(odd, sched_rev, sched_fwd)
    last_valid = jnp.take_along_axis(sched_valid, jnp.maximum(cnt - 1, 0)[:, None], axis=1)
    sched = jnp.where(slot < cnt[:, None], sched_valid, last_valid)
    sched_flat = sched.reshape(-1).astype(jnp.int32)    # 1D SMEM (avoid 2D lane padding)

    y = moe_experts_pallas(x_pad, combine_w, sched_flat, cnt,
                           prepared["wgu"], prepared["wd"],
                           token_tile=TT, out_dtype=out_dtype,
                           max_weight_buffers=max_weight_buffers)
    return y[:T].reshape(bsz, seq_len, H)


def moe_feedforward_ref(x, prepared, *, top_k, norm_topk_prob=True):
    """Pure-JAX reference with the same bf16-matmul / f32-accumulate numerics."""
    bsz, seq_len, H = x.shape
    T = bsz * seq_len
    x_flat = x.reshape(T, H)
    E = prepared["gate_w"].shape[0]
    E_tot = prepared["wgu"].shape[0]
    n_shared = E_tot - E
    I = prepared["wd"].shape[1]

    topk_idx, topk_w = moe_gate(x_flat, prepared["gate_w"], top_k, norm_topk_prob)
    routed_cw = jnp.zeros((T, E), jnp.float32).at[
        jnp.arange(T)[:, None], topk_idx].set(topk_w.astype(jnp.float32))
    shared_cw = jnp.ones((T, n_shared), jnp.float32)
    combine_w = jnp.concatenate([routed_cw, shared_cw], axis=-1)

    xb = x_flat.astype(jnp.bfloat16)
    y = jnp.zeros((T, H), jnp.float32)
    for e in range(E_tot):
        gu = jnp.dot(xb, prepared["wgu"][e], preferred_element_type=jnp.float32)
        g, u = gu[:, :I], gu[:, I:]
        h = (g * jax.nn.sigmoid(g)) * u
        ye = jnp.dot(h.astype(jnp.bfloat16), prepared["wd"][e],
                     preferred_element_type=jnp.float32)
        y = y + combine_w[:, e:e + 1] * ye
    return y.astype(x.dtype).reshape(bsz, seq_len, H)


if __name__ == "__main__":
    # Small config consistent with MiniMindConfig(use_moe=True)
    hidden_size = 32
    intermediate_size = 64 * ((int(hidden_size * 8 / 3) + 64 - 1) // 64)  # 128
    n_routed_experts = 4
    num_experts_per_tok = 2
    n_shared_experts = 1
    bsz, seq_len = 2, 8

    key = jax.random.PRNGKey(0)
    ks = jax.random.split(key, 8)
    scale = 0.05
    params = {
        # MoEGate weight: (E, H)  (F.linear uses x @ W.T)
        "gate_w": scale * jax.random.normal(ks[0], (n_routed_experts, hidden_size), jnp.float32),
        # Routed experts, already transposed to (E, in, out)
        "routed_wg": scale * jax.random.normal(ks[1], (n_routed_experts, hidden_size, intermediate_size), jnp.float32),
        "routed_wu": scale * jax.random.normal(ks[2], (n_routed_experts, hidden_size, intermediate_size), jnp.float32),
        "routed_wd": scale * jax.random.normal(ks[3], (n_routed_experts, intermediate_size, hidden_size), jnp.float32),
        # Shared experts
        "shared_wg": scale * jax.random.normal(ks[4], (n_shared_experts, hidden_size, intermediate_size), jnp.float32),
        "shared_wu": scale * jax.random.normal(ks[5], (n_shared_experts, hidden_size, intermediate_size), jnp.float32),
        "shared_wd": scale * jax.random.normal(ks[6], (n_shared_experts, intermediate_size, hidden_size), jnp.float32),
    }
    x = jax.random.normal(ks[7], (bsz, seq_len, hidden_size), jnp.float32)

    prepared = prepare_moe_params(params)   # once, outside jit (no per-call weight concat/fuse)

    # token_tile=8 -> 2 token tiles at this toy size (exercises scheduling + serpentine)
    fwd = jax.jit(functools.partial(moe_feedforward, top_k=num_experts_per_tok,
                                    token_tile=8))
    try:
        y = fwd(x, prepared)
        jax.block_until_ready(y)
    except Exception:
        # Safety net: retry with default double-buffered weight pipeline if the
        # installed Pallas rejects the deeper pl.Buffered(3) weight pipelining.
        fwd = jax.jit(functools.partial(moe_feedforward, top_k=num_experts_per_tok,
                                        token_tile=8, max_weight_buffers=2))
        y = fwd(x, prepared)
        jax.block_until_ready(y)

    y_ref = moe_feedforward_ref(x, prepared, top_k=num_experts_per_tok)
    assert y.shape == (bsz, seq_len, hidden_size)
    assert y.dtype == x.dtype
    assert jnp.allclose(y, y_ref, atol=2e-3, rtol=2e-3), "mismatch vs reference"

    print("KERNEL_OK")
</pallas_src>

<mosaic_0001>
module attributes {stable_mosaic.version = 11 : i64} {
  func.func @_moe_expert_kernel(%arg0: i32, %arg1: i32, %arg2: memref<10xi32, #tpu.memory_space<smem>>, %arg3: memref<2xi32, #tpu.memory_space<smem>>, %arg4: memref<8x32xbf16, #tpu.memory_space<vmem>>, %arg5: memref<8x5xf32, #tpu.memory_space<vmem>>, %arg6: memref<1x32x256xbf16, #tpu.memory_space<vmem>>, %arg7: memref<1x128x32xbf16, #tpu.memory_space<vmem>>, %arg8: memref<8x32xf32, #tpu.memory_space<vmem>>, %arg9: memref<8x32xf32, #tpu.memory_space<vmem>>) attributes {dimension_semantics = [#tpu.dimension_semantics<parallel>, #tpu.dimension_semantics<arbitrary>], iteration_bounds = array<i64: 2, 5>, scalar_prefetch = 2 : i64, scratch_operands = 1 : i64, tpu.core_type = #tpu.core_type<tc>, window_params = [{transform_indices = @transform_0, window_bounds = array<i64: 8, 32>}, {transform_indices = @transform_1, window_bounds = array<i64: 8, 5>}, {transform_indices = @transform_2, window_bounds = array<i64: 1, 32, 256>}, {transform_indices = @transform_3, window_bounds = array<i64: 1, 128, 32>}, {transform_indices = @transform_4, window_bounds = array<i64: 8, 32>}]} {
    %c0_i32 = arith.constant 0 : i32
    %0 = arith.cmpi eq, %arg1, %c0_i32 : i32
    %1 = arith.extui %0 : i1 to i32
    %c0_i32_0 = arith.constant 0 : i32
    %2 = arith.cmpi ne, %1, %c0_i32_0 : i32
    scf.if %2 {
      %cst = arith.constant 0.000000e+00 : f32
      %11 = vector.broadcast %cst : f32 to vector<8x32xf32>
      %c0 = arith.constant 0 : index
      %c0_3 = arith.constant 0 : index
      %12 = vector.load %arg9[%c0, %c0_3] : memref<8x32xf32, #tpu.memory_space<vmem>>, vector<8x32xf32>
      tpu.vector_store %arg9[%c0, %c0_3], %11 {strides = array<i32>} : memref<8x32xf32, #tpu.memory_space<vmem>>, vector<8x32xf32>,
    } else {
    }
    %3 = arith.index_cast %arg0 : i32 to index
    %4 = memref.load %arg3[%3] : memref<2xi32, #tpu.memory_space<smem>>
    %5 = arith.cmpi slt, %arg1, %4 : i32
    %6 = arith.extui %5 : i1 to i32
    %c0_i32_1 = arith.constant 0 : i32
    %7 = arith.cmpi ne, %6, %c0_i32_1 : i32
    scf.if %7 {
      %c5_i32 = arith.constant 5 : i32
      %11 = arith.muli %arg0, %c5_i32 : i32
      %12 = arith.addi %11, %arg1 : i32
      %13 = arith.index_cast %12 : i32 to index
      %14 = memref.load %arg2[%13] : memref<10xi32, #tpu.memory_space<smem>>
      %c0 = arith.constant 0 : index
      %c0_3 = arith.constant 0 : index
      %15 = vector.load %arg4[%c0, %c0_3] : memref<8x32xbf16, #tpu.memory_space<vmem>>, vector<8x32xbf16>
      %c0_4 = arith.constant 0 : index
      %c0_5 = arith.constant 0 : index
      %c0_6 = arith.constant 0 : index
      %16 = vector.load %arg6[%c0_4, %c0_5, %c0_6] : memref<1x32x256xbf16, #tpu.memory_space<vmem>>, vector<1x32x256xbf16>
      %17 = vector.shape_cast %16 : vector<1x32x256xbf16> to vector<32x256xbf16>
      %cst = arith.constant dense<0.000000e+00> : vector<8x256xf32>
      %18 = tpu.matmul %15, %17, %cst {dimension_numbers = #tpu.dot_dimension_numbers<[1], [0], [0], [1], [0, 0, 1, 1], [], []>} : vector<8x32xbf16>, vector<32x256xbf16>, vector<8x256xf32> -> vector<8x256xf32>
      %19 = vector.extract_strided_slice %18 {offsets = [0, 0], sizes = [8, 128], strides = [1, 1]} : vector<8x256xf32> to vector<8x128xf32>
      %20 = vector.extract_strided_slice %18 {offsets = [0, 128], sizes = [8, 128], strides = [1, 1]} : vector<8x256xf32> to vector<8x128xf32>
      %21 = arith.negf %19 : vector<8x128xf32>
      %22 = math.exp %21 : vector<8x128xf32>
      %cst_7 = arith.constant 1.000000e+00 : f32
      %23 = vector.broadcast %cst_7 : f32 to vector<8x128xf32>
      %24 = arith.addf %23, %22 : vector<8x128xf32>
      %25 = arith.divf %23, %24 : vector<8x128xf32>
      %26 = arith.mulf %19, %25 : vector<8x128xf32>
      %27 = arith.mulf %26, %20 : vector<8x128xf32>
      %28 = arith.truncf %27 : vector<8x128xf32> to vector<8x128xbf16>
      %c0_8 = arith.constant 0 : index
      %c0_9 = arith.constant 0 : index
      %c0_10 = arith.constant 0 : index
      %29 = vector.load %arg7[%c0_8, %c0_9, %c0_10] : memref<1x128x32xbf16, #tpu.memory_space<vmem>>, vector<1x128x32xbf16>
      %30 = vector.shape_cast %29 : vector<1x128x32xbf16> to vector<128x32xbf16>
      %cst_11 = arith.constant dense<0.000000e+00> : vector<8x32xf32>
      %31 = tpu.matmul %28, %30, %cst_11 {dimension_numbers = #tpu.dot_dimension_numbers<[1], [0], [0], [1], [0, 0, 1, 1], [], []>} : vector<8x128xbf16>, vector<128x32xbf16>, vector<8x32xf32> -> vector<8x32xf32>
      %32 = tpu.iota {dimensions = array<i32: 1>} : vector<8x5xi32>
      %33 = vector.broadcast %14 : i32 to vector<8x5xi32>
      %34 = arith.cmpi eq, %32, %33 : vector<8x5xi32>
      %c0_12 = arith.constant 0 : index
      %c0_13 = arith.constant 0 : index
      %35 = vector.load %arg5[%c0_12, %c0_13] : memref<8x5xf32, #tpu.memory_space<vmem>>, vector<8x5xf32>
      %cst_14 = arith.constant 0.000000e+00 : f32
      %36 = vector.broadcast %cst_14 : f32 to vector<8x5xf32>
      %37 = arith.select %34, %35, %36 : vector<8x5xi1>, vector<8x5xf32>
      %cst_15 = arith.constant dense<0.000000e+00> : vector<8xf32>
      %38 = vector.multi_reduction <add>, %37, %cst_15 [1] : vector<8x5xf32> to vector<8xf32>
      %39 = vector.shape_cast %38 : vector<8xf32> to vector<8x1xf32>
      %c0_16 = arith.constant 0 : index
      %c0_17 = arith.constant 0 : index
      %40 = vector.load %arg9[%c0_16, %c0_17] : memref<8x32xf32, #tpu.memory_space<vmem>>, vector<8x32xf32>
      %41 = vector.broadcast %39 : vector<8x1xf32> to vector<8x32xf32>
      %42 = arith.mulf %41, %31 : vector<8x32xf32>
      %43 = arith.addf %40, %42 : vector<8x32xf32>
      %c0_18 = arith.constant 0 : index
      %c0_19 = arith.constant 0 : index
      %44 = vector.load %arg9[%c0_18, %c0_19] : memref<8x32xf32, #tpu.memory_space<vmem>>, vector<8x32xf32>
      tpu.vector_store %arg9[%c0_18, %c0_19], %43 {strides = array<i32>} : memref<8x32xf32, #tpu.memory_space<vmem>>, vector<8x32xf32>,
    } else {
    }
    %c4_i32 = arith.constant 4 : i32
    %8 = arith.cmpi eq, %arg1, %c4_i32 : i32
    %9 = arith.extui %8 : i1 to i32
    %c0_i32_2 = arith.constant 0 : i32
    %10 = arith.cmpi ne, %9, %c0_i32_2 : i32
    scf.if %10 {
      %c0 = arith.constant 0 : index
      %c0_3 = arith.constant 0 : index
      %11 = vector.load %arg9[%c0, %c0_3] : memref<8x32xf32, #tpu.memory_space<vmem>>, vector<8x32xf32>
      %c0_4 = arith.constant 0 : index
      %c0_5 = arith.constant 0 : index
      %12 = vector.load %arg8[%c0_4, %c0_5] : memref<8x32xf32, #tpu.memory_space<vmem>>, vector<8x32xf32>
      tpu.vector_store %arg8[%c0_4, %c0_5], %11 {strides = array<i32>} : memref<8x32xf32, #tpu.memory_space<vmem>>, vector<8x32xf32>,
    } else {
    }
    return
  }
  func.func @transform_0(%arg0: i32, %arg1: i32, %arg2: memref<10xi32, #tpu.memory_space<smem>>, %arg3: memref<2xi32, #tpu.memory_space<smem>>) -> (i32, i32) {
    %c0_i32 = arith.constant 0 : i32
    %c0_i32_0 = arith.constant 0 : i32
    return %arg0, %c0_i32 : i32, i32
  }
  func.func @transform_1(%arg0: i32, %arg1: i32, %arg2: memref<10xi32, #tpu.memory_space<smem>>, %arg3: memref<2xi32, #tpu.memory_space<smem>>) -> (i32, i32) {
    %c0_i32 = arith.constant 0 : i32
    %c0_i32_0 = arith.constant 0 : i32
    return %arg0, %c0_i32 : i32, i32
  }
  func.func @transform_2(%arg0: i32, %arg1: i32, %arg2: memref<10xi32, #tpu.memory_space<smem>>, %arg3: memref<2xi32, #tpu.memory_space<smem>>) -> (i32, i32, i32) {
    %c5_i32 = arith.constant 5 : i32
    %0 = arith.muli %arg0, %c5_i32 : i32
    %1 = arith.addi %0, %arg1 : i32
    %2 = arith.index_cast %1 : i32 to index
    %3 = memref.load %arg2[%2] : memref<10xi32, #tpu.memory_space<smem>>
    %c0_i32 = arith.constant 0 : i32
    %c0_i32_0 = arith.constant 0 : i32
    %c0_i32_1 = arith.constant 0 : i32
    return %3, %c0_i32, %c0_i32_0 : i32, i32, i32
  }
  func.func @transform_3(%arg0: i32, %arg1: i32, %arg2: memref<10xi32, #tpu.memory_space<smem>>, %arg3: memref<2xi32, #tpu.memory_space<smem>>) -> (i32, i32, i32) {
    %c5_i32 = arith.constant 5 : i32
    %0 = arith.muli %arg0, %c5_i32 : i32
    %1 = arith.addi %0, %arg1 : i32
    %2 = arith.index_cast %1 : i32 to index
    %3 = memref.load %arg2[%2] : memref<10xi32, #tpu.memory_space<smem>>
    %c0_i32 = arith.constant 0 : i32
    %c0_i32_0 = arith.constant 0 : i32
    %c0_i32_1 = arith.constant 0 : i32
    return %3, %c0_i32, %c0_i32_0 : i32, i32, i32
  }
  func.func @transform_4(%arg0: i32, %arg1: i32, %arg2: memref<10xi32, #tpu.memory_space<smem>>, %arg3: memref<2xi32, #tpu.memory_space<smem>>) -> (i32, i32) {
    %c0_i32 = arith.constant 0 : i32
    %c0_i32_0 = arith.constant 0 : i32
    return %arg0, %c0_i32 : i32, i32
  }
}

</mosaic_0001>

<bundles_post_ra>
// kernel: moe_feedforward.1
= control target key start
LH: loop header
LB: loop body
LE: loop exit
PB: predicated region body
PF: predicated region fallthrough
CT: control target
= control target key end

     0   :  { %s1159_s0 = inlined_call_operand.vmem [shape: s32[10], index: 0, kind: input, shape index: {}]   ;;  %s1160_s2 = inlined_call_operand.vmem [shape: bf16[16,32], index: 2, kind: input, shape index: {}]   ;;  %s1161_s3 = inlined_call_operand.vmem [shape: f32[16,5], index: 3, kind: input, shape index: {}]   ;;  %s1162_s4 = inlined_call_operand.vmem [shape: bf16[5,32,256], index: 4, kind: input, shape index: {}]   ;;  %s1163_s5 = inlined_call_operand.vmem [shape: bf16[5,128,32], index: 5, kind: input, shape index: {}]   ;;  %s1164_s6 = inlined_call_operand.hbm [shape: f32[16,32], index: 6, kind: output, shape index: {}]   ;;  %s1165_s1 = inlined_call_operand.vmem [shape: s32[2], index: 1, kind: input, shape index: {}]  }
   0x1   :  { %s11_s23 = sshll.u32 %s1159_s0, 4  ;;  %s15_s26 = sshll.u32 %s1165_s1, 4  ;;  %s12_s23 = int_to_ptr.vmem [resolvable:$true] %s11_s23  ;;  %s16_s26 = int_to_ptr.vmem [resolvable:$true] %s15_s26 }
   0x2   :  { %s814_s27 = scalar_lea.vmem %s12_s23, 16  ;;  %p819_p1 = scmp.lt.s32.totalorder %s12_s23, %s12_s23 }
   0x3   :  { %p815_p0 = scmp.ne.s32.totalorder %s12_s23, %s814_s27  ;;  %p820_p2 = scmp.lt.s32.totalorder %s814_s27, %s814_s27 }
   0x5   :  { %p821_p3 = por %p820_p2, %p819_p1 }
   0x7   :  { %p822_p4 = pnand %p821_p3, %p815_p0 }
   0x9   :  { %825 = shalt.err (!%p822_p4)  }
   0xa   :  { %s936_s28 = smov [#allocation4]   ;;  %s826_s29 = scalar_lea.vmem %s16_s26, 16 }
   0xb   :  { %14 = dma.vmem_to_smem %s12_s23, 16, %s936_s28, [#allocation3] }
   0xc   :  { %p827_p5 = scmp.ne.s32.totalorder %s16_s26, %s826_s29  ;;  %p831_p6 = scmp.lt.s32.totalorder %s16_s26, %s16_s26 }
   0xd   :  { %p832_p7 = scmp.lt.s32.totalorder %s826_s29, %s826_s29 }
   0xf   :  { %p833_p8 = por %p832_p7, %p831_p6 }
  0x11   :  { %p834_p9 = pnand %p833_p8, %p827_p5 }
  0x13   :  { %837 = shalt.err (!%p834_p9)  }
  0x14   :  { %s937_s0 = smov [#allocation5]  }
  0x15   :  { %18 = dma.vmem_to_smem %s16_s26, 16, %s937_s0, [#allocation3] }
  0x16   :  { %898 = dma.done.wait [#allocation3], 32 }
  0x17   :  { %899 = vsyncadd [#allocation3], 4294967264 }
  0x18   :  { %20 = sfence }
  0x19   :  { %21 = vsyncpa [#allocation7], 0 }
  0x1a   :  { %23 = vsyncpa [#allocation7 + $0x1], 0  ;;  %s984_s1 = smov 0   ;;  %s986_s30 = smov 0  }
  0x1b   :  { %s988_s7 = smov 0   ;;  %s990_s8 = smov 0  }
  0x1c   :  { %s992_s9 = smov 0   ;;  %s994_s10 = smov 0  }
  0x1d   :  { %s996_s11 = smov 0   ;;  %s998_s12 = smov 0  }
  0x1e LB: > { %1170 = sst [smem:[#allocation10_spill]] %s926_s10  ;;  %s655_s13 = sadd.s32 4294967295, %s934_s12   ;;  %s934_s12 = sphi %s998_s12, %s29_s12   ;;  %s930_s11 = sphi %s996_s11, %s1180_s11   ;;  %s926_s10 = sphi %s994_s10, %s1179_s10   ;;  %s922_s9 = sphi %s992_s9, %s1178_s9   ;;  %s918_s8 = sphi %s990_s8, %s1177_s8   ;;  %s914_s7 = sphi %s988_s7, %s1183_s7   ;;  %s910_s30 = sphi %s986_s30, %s1182_s30   ;;  %s906_s1 = sphi %s984_s1, %s1181_s1  }
  0x1f   : > { %1171 = sst [smem:[#allocation11_spill]] %s930_s11  ;;  %s656_s14 = sadd.s32 4294967294, %s934_s12  }
  0x20   : > { %s38_s15 = sadd.s32 1, %s926_s10  ;;  %s41_s16 = sadd.s32 1, %s930_s11 }
  0x21   : > { %p39_p10 = scmp.ge.s32.totalorder %s38_s15, 5  ;;  %p174_p11 = scmp.ne.s32.totalorder %s914_s7, %s910_s30 }
  0x22   : > { %p175_p12 = scmp.eq.s32.totalorder %s655_s13, 9  ;;  %p180_p0 = scmp.ne.s32.totalorder %s910_s30, %s906_s1 }
  0x23   : > { %s1185_s15 = smov (%p39_p10, %s38_s15), 0  ;;  %s1187_s16 = smov (!%p39_p10, %s41_s16), %s930_s11 }
  0x24   : > { %1172 = sst [smem:[#allocation12_spill]] %s1185_s15  ;;  %p1033_p13 = por %p175_p12, %p174_p11 }
  0x25   : > { %p43_p1 = scmp.ge.s32.totalorder %s1187_s16, 2  ;;  %p181_p2 = scmp.eq.s32.totalorder %s656_s14, 9 }
  0x26   : > { %p659_p3 = scmp.ge.s32.totalorder %s934_s12, 1  ;;  %p241_p4 = scmp.lt.s32.totalorder %s934_s12, 11 }
  0x27   : > { %s1189_s16 = smov (%p43_p1, %s1187_s16), 0  ;;  %p1043_p5 = por %p181_p2, %p180_p0 }
  0x28   : > { %1174 = sst [smem:[#allocation13_spill]] %s1189_s16  ;;  %p242_p6 = pnand %p659_p3, %p241_p4 }
  0x29   : > { %s161_s19 = ssub.s32 %s930_s11, %s1189_s16  ;;  %s164_s20 = sadd.s32 1, %s914_s7 }
  0x2a   : > { %p162_p7 = scmp.eq.s32.totalorder %s161_s19, 0  ;;  %245 = sbr.rel (%p242_p6) target bundleno = 572 (0x23c), region = 36 }
  0x2b   : > { %s1166_s22 = sand.u32 (!%p242_p6), 1, %s910_s30   ;;  %p286_p8 = scmp.lt.s32.totalorder (!%p242_p6), %s922_s9, 1 }
  0x2c   : > { %s1051_s21 = scalar_select %p162_p7, %s914_s7, %s164_s20  }
  0x2d   : > { %s1057_s23 = sshll.u32 (!%p242_p6), %s1166_s22, 3  ;;  %s294_s24 = smul.u32 (!%p242_p6), 5, %s922_s9 }
  0x2e   : > { %s285_s14 = scalar_lea.vmem (!%p242_p6), [#allocation6], %s1057_s23  ;;  %p667_p11 = scmp.ne.s32.totalorder (!%p242_p6), %s918_s8, 0 }
  0x2f   : > { %s1062_s26 = sadd.s32 (!%p242_p6), %s918_s8, %s294_s24 }
  0x30   : > { %s296_s22 = sld [smem:[#allocation4 + %s1062_s26]] (!%p242_p6) }
  0x31   : > { %s287_s25 = scalar_select %p286_p8, %s922_s9, 1 }
  0x32   : > { %s307_s16 = sld [smem:[#allocation4 + %s1062_s26]]  ;;  %vm321_vm0 = vcmask (!%p667_p11), 261120   ;;  %v938_v0 = vmov (!%p667_p11), 0.0  }
  0x33   : > { %s661_s27 = sshll.u32 %s287_s25, 2  ;;  %s662_s28 = sshll.u32 %s287_s25, 3  ;;  %322 = vst.msk [vmem:[#allocation2] sm:$0xff] (!%p667_p11), %vm321_vm0, %v938_v0 }
  0x34   : > { %s1067_s13 = scalar_lea.vmem %s1160_s2, %s661_s27  ;;  %s1072_s20 = scalar_lea.vmem %s1161_s3, %s662_s28 }
  0x36   : > { %p297_p9 = scmp.lt.s32.totalorder %s296_s22, 4  ;;  %320 = sbr.rel (%p667_p11) target bundleno = 61 (0x3d), region = 40 }
  0x38   : > { %p308_p10 = scmp.lt.s32.totalorder %s307_s16, 4  ;;  %s1191_s22 = smov (!%p297_p9, %s296_s22), 4 }
  0x39   : > { %s688_s24 = sshll.u32 %s1191_s22, 5 }
  0x3a   : > { %s1193_s16 = smov (!%p308_p10, %s307_s16), 4  ;;  %s301_s25 = scalar_lea.vmem %s1162_s4, %s688_s24 }
  0x3b   : > { %s689_s10 = sshll.u32 %s1193_s16, 6 }
  0x3c   : > { %s1082_s0 = scalar_lea.vmem %s1163_s5, %s689_s10 }
  0x3d PF: > { %s323_s22 = sld [smem:[#allocation5 + %s922_s9]] }
  0x43   : > { %p668_p12 = scmp.ge.s32.totalorder %s918_s8, %s323_s22 }
  0x44   : > { %v796_v1 = vld [vmem:[%s301_s25 + $0x4] ss:$8 sps:$4 sm:$0xff] (!%p668_p12)   ;;  %v798_v2 = vld [vmem:[%s301_s25] ss:$8 sps:$4 sm:$0xff] (!%p668_p12)   ;;  %v939_v3 = vmov (!%p668_p12), 0   ;;  %vm356_vm1 = vcmask (!%p668_p12), 261120   ;;  %v514_v16 = vlaneseq (!%p668_p12) }
  0x45   : > { %327 = sbr.rel (%p668_p12) target bundleno = 538 (0x21a), region = 44  ;;  %392 = vmatprep.mubr.bf16.mxu0 (!%p668_p12), %v939_v3  ;;  %360 = vmatprep.subr.bf16.mxu0 (!%p668_p12), %v796_v1  ;;  %v799_v4 = vld [vmem:[%s301_s25 + $0x14] ss:$8 sps:$4 sm:$0xff] (!%p668_p12)   ;;  %v801_v5 = vld [vmem:[%s301_s25 + $0x10] ss:$8 sps:$4 sm:$0xff] (!%p668_p12)   ;;  %v802_v7 = vld [vmem:[%s1082_s0] sm:$0xff] (!%p668_p12)  }
  0x46   : > { %361 = vmatpush1.bf16.msra.mxu0 (!%p668_p12), %v798_v2  ;;  %v331_v6 = vld [vmem:[%s1067_s13] sm:$0xf] (!%p668_p12)  ;;  %v940_v8 = vmov (!%p668_p12), 0.0   ;;  %v803_v9 = vld [vmem:[%s1082_s0 + $0x8] sm:$0xff] (!%p668_p12)   ;;  %v804_v10 = vld [vmem:[%s1082_s0 + $0x10] sm:$0xff] (!%p668_p12)   ;;  %vm941_vm2 = vmmov (!%p668_p12), 0  }
  0x47   : > { %362 = vmatprep.subr.bf16.mxu0 (!%p668_p12), %v799_v4  ;;  %699 = vmatprep.subr.bf16.mxu1 (!%p668_p12), %v940_v8  ;;  %v805_v11 = vld [vmem:[%s1082_s0 + $0x18] sm:$0xff] (!%p668_p12)   ;;  %v806_v12 = vld [vmem:[%s1082_s0 + $0x20] sm:$0xff] (!%p668_p12)   ;;  %v807_v13 = vld [vmem:[%s1082_s0 + $0x28] sm:$0xff] (!%p668_p12)   ;;  %s330_s10 = sld [smem:[#allocation4 + %s1062_s26]] (!%p668_p12)  ;;  %v515_v17 = vand.u32 (!%p668_p12), 127, %v514_v16  ;;  %vm520_vm3 = vcmask (!%p668_p12), 39936  }
  0x48   : > { %700 = vmatpush3.bf16.msra.mxu1 (!%p668_p12), %v802_v7  ;;  %v808_v14 = vld [vmem:[%s1082_s0 + $0x30] sm:$0xff] (!%p668_p12)   ;;  %v809_v15 = vld [vmem:[%s1082_s0 + $0x38] sm:$0xff] (!%p668_p12)   ;;  %715 = vmatprep.mubr.msk.bf16.mxu1 (!%p668_p12), %vm941_vm2, %v940_v8  ;;  %v518_v18 = vld [vmem:[%s1072_s20] sm:$0xff] (!%p668_p12) }
  0x49   : > { %701 = vmatprep.subr.bf16.mxu1 (!%p668_p12), %v940_v8  ;;  %v524_v35 = vld [vmem:[#allocation2] sm:$0xff] (!%p668_p12) }
  0x4a   : > { %363 = vmatpush1.bf16.msra.mxu0 (!%p668_p12), %v801_v5 }
  0x4c   : > { %702 = vmatpush3.bf16.msra.mxu1 %v803_v9 }
  0x4d   : > { %673 = vmatmul.mubr.msk.bf16.vlgmr.msra.gmra.mrb[0].mxu0 %vm356_vm1, %v331_v6  ;;  %703 = vmatprep.subr.bf16.mxu1 %v940_v8  ;;  %v516_v19 = vstv %s330_s10 }
  0x4e   : > { %vm517_vm4 = vcmp.eq.s32.totalorder %v515_v17, %v516_v19 }
  0x4f   : > { %v519_v20 = vsel %vm517_vm4, %v518_v18, 0.0 }
  0x50   : > { %704 = vmatpush3.bf16.msra.mxu1 %v804_v10  ;;  %v521_v21 = vsel %vm520_vm3, %v519_v20, 0.0 }
  0x51   : > { %705 = vmatprep.subr.bf16.mxu1 %v940_v8  ;;  %522 = vadd.xlane.f32.xlu0 %v521_v21 }
  0x54   : > { %706 = vmatpush3.bf16.msra.mxu1 %v805_v11 }
  0x55   : > { %707 = vmatprep.subr.bf16.mxu1 %v940_v8 }
  0x58   : > { %708 = vmatpush3.bf16.msra.mxu1 %v806_v12 }
  0x59   : > { %709 = vmatprep.subr.bf16.mxu1 %v940_v8 }
  0x5c   : > { %710 = vmatpush3.bf16.msra.mxu1 %v807_v13 }
  0x5d   : > { %711 = vmatprep.subr.bf16.mxu1 %v940_v8 }
  0x60   : > { %712 = vmatpush3.bf16.msra.mxu1 %v808_v14 }
  0x61   : > { %713 = vmatprep.subr.bf16.mxu1 %v940_v8 }
  0x64   : > { %714 = vmatpush3.bf16.msra.mxu1 %v809_v15 }
  0xde   : > { %v523_v33 = vpop.xlane.xlu0 %522 }
 0x120   : > { %v394_v22 = vpop.f32.mrb[0].mxu0 }
 0x121   : > { %v674_v23 = vmul.f32 -1.442695, %v394_v22  ;;  %v396_v24 = vpop.f32.mrb[1].mxu0 }
 0x122   : > { %v398_v25 = vpop.f32.mrb[2].mxu0 }
 0x123   : > { %810 = vpow2.f32 %v674_v23  ;;  %v399_v26 = vpop.f32.mrb[3].mxu0 }
 0x12d   : > { %v811_v27 = vpop.eup %810 }
 0x12e   : > { %v404_v28 = vadd.f32 1.0, %v811_v27 }
 0x130   : > { %812 = vrcp.f32 %v404_v28 }
 0x13a   : > { %v813_v29 = vpop.eup %812 }
 0x13b   : > { %v407_v30 = vmul.f32 %v813_v29, %v394_v22 }
 0x13d   : > { %v408_v31 = vmul.f32 %v407_v30, %v396_v24 }
 0x13f   : > { %v409_v32 = vpack.c.bf16 %v408_v31, %v408_v31 }
 0x141   : > { %716 = vmatmul.mubr.bf16.vlgmr.msra.gmra.mrb[0].mxu1 %v409_v32 }
 0x214   : > { %v508_v34 = vpop.f32.mrb[0].mxu1 }
 0x215   : > { %v525_v36 = vmul.f32 %v523_v33, %v508_v34  ;;  %v717_v37 = vpop.f32.mrb[1].mxu1 }
 0x216   : > { %v511_v38 = vpop.f32.mrb[2].mxu1 }
 0x217   : > { %v526_v39 = vadd.f32 %v525_v36, %v524_v35  ;;  %v718_v40 = vpop.f32.mrb[3].mxu1 }
 0x219   : > { %527 = vst.msk [vmem:[#allocation2] sm:$0xff] %vm356_vm1, %v526_v39 }
 0x21a PF: > { %p683_p0 = scmp.ne.s32.totalorder %s918_s8, 4 }
 0x21b   : > { %vm533_vm5 = vcmask (!%p683_p0), 261120  }
 0x21c   : > { %531 = sbr.rel (%p683_p0) target bundleno = 547 (0x223), region = 48 }
 0x220   : > { %v532_v41 = vld [vmem:[#allocation2] sm:$0xff] (!%p683_p0) }
 0x221   : > { %534 = vst.msk [vmem:[%s285_s14] sm:$0xff] (!%p683_p0), %vm533_vm5, %v532_v41 }
 0x223 PF: > { %s685_s11 = sshll.u32 %s922_s9, 7  ;;  %s549_s28 = sshll.u32 %s285_s14, 4  ;;  %s550_s28 = int_to_ptr.vmem [resolvable:$true] %s549_s28 }
 0x224   : > { %s1108_s26 = scalar_lea.hbm %s1164_s6, %s685_s11  ;;  %s1176_s8 = sand.u32 1, %s910_s30  }
 0x225   : > { %s536_s13 = scalar_lea.sflag [#allocation7], %s1176_s8  ;;  %s838_s19 = scalar_lea.vmem %s550_s28, 128 }
 0x226   : > { %p839_p1 = scmp.ne.s32.totalorder %s550_s28, %s838_s19  ;;  %s942_s20 = smov [#allocation6]  }
 0x227   : > { %s842_s24 = sshll.u32 %s942_s20, 4  ;;  %s843_s24 = int_to_ptr.vmem [resolvable:$false] %s842_s24 }
 0x228   : > { %p840_p2 = pnand %p839_p1, %p1033_p13  ;;  %s844_s25 = scalar_lea.vmem %s843_s24, 256 }
 0x229   : > { %p845_p4 = scmp.lt.s32.totalorder %s550_s28, %s843_s24  ;;  %p846_p6 = scmp.lt.s32.totalorder %s844_s25, %s838_s19 }
 0x22a   : > { %p841_p3 = pneg %p840_p2 }
 0x22b   : > { %p847_p7 = por %p846_p6, %p845_p4 }
 0x22d   : > { %p848_p8 = pnand %p847_p7, %p841_p3 }
 0x22f   : > { %851 = shalt.err (!%p848_p8)
}
 0x230   : > { %s852_s9 = scalar_lea.hbm %s1108_s26, 128  ;;  %s856_s27 = scalar_lea.hbm %s1164_s6, 256 }
 0x231   : > { %p853_p9 = scmp.ne.s32.totalorder %s1108_s26, %s852_s9  ;;  %p857_p12 = scmp.lt.u32.totalorder %s1108_s26, %s1164_s6 }
 0x232   : > { %p858_p0 = scmp.lt.u32.totalorder %s856_s27, %s852_s9  ;;  %p860_p2 = scmp.lt.u32.totalorder %s852_s9, %s1108_s26 }
 0x233   : > { %p854_p10 = pnand %p853_p9, %p1033_p13 }
 0x234   : > { %p859_p1 = por %p858_p0, %p857_p12 }
 0x235   : > { %p855_p11 = pneg %p854_p10 }
 0x236   : > { %p861_p3 = por %p860_p2, %p859_p1 }
 0x238   : > { %p862_p4 = pnand %p861_p3, %p855_p11 }
 0x23a   : > { %865 = shalt.err (!%p862_p4)
}
 0x23b   : > { %719 = dma.vmem_to_hbm [thread:$0]  (%p1033_p13), %s550_s28, 128, %s1108_s26, %s536_s13  }
 0x23c PF: > { %p725_p6 = scmp.ge.s32.totalorder %s934_s12, 2  ;;  %s561_s22 = sand.u32 1, %s906_s1  }
 0x23d   : > { %s562_s10 = scalar_lea.sflag [#allocation7], %s561_s22 }
 0x23e   : > { %p722_p7 = pnand %p725_p6, %p1043_p5 }
 0x240   : > { %901 = dma.done.wait (!%p722_p7), %s562_s10, 128  }
 0x241   : > { %903 = vsyncadd (!%p722_p7), %s562_s10, 4294967168  ;;  %s29_s12 = sadd.s32 1, %s934_s12   ;;  %s1177_s8 = sld [smem:[#allocation10_spill]] }
 0x242   : > { %p26_p8 = scmp.ge.s32.totalorder %s29_s12, 12   ;;  %s1178_s9 = sld [smem:[#allocation11_spill]] }
 0x243   : > { %s1179_s10 = sld [smem:[#allocation12_spill]]  ;;  %s1180_s11 = sld [smem:[#allocation13_spill]] }
 0x244   : > { %s1181_s1 = smov %s910_s30  ;;  %s1182_s30 = smov %s914_s7 }
 0x245   : > { %s1183_s7 = smov %s1051_s21  ;;  %28 = sbr.rel (!%p26_p8) target bundleno = 30 (0x1e), region = 92 }
 0x24c   :  { %567 = vsyncpa [#allocation7], 1 }
 0x24d   :  { %569 = vsyncpa [#allocation7 + $0x1], 1 }

</bundles_post_ra>
